<compile_context>
chip_gen: v7x
topology: tpu7x:2x2x1
jax: 0.10.0
libtpu: 0.0.40
codegen_flags: <defaults>
</compile_context>

<pallas_src>
import math

import jax
import jax.numpy as jnp
from jax import lax
from jax.experimental import pallas as pl
from jax.experimental.pallas import tpu as pltpu


def _round_up(a, m):
    return (a + m - 1) // m * m


def _make_kernel(*, n_valid, tq, tk, dp, scale, mask_keys):
    def kernel(xq_ref, xkv_ref, wqkv_ref, o_ref, q_s, m_s, l_s, acc_s):
        ki = pl.program_id(2)
        nk = pl.num_programs(2)

        @pl.when(ki == 0)
        def _init():
            # Project the query rows once per (batch, q-block); fold the
            # 1/sqrt(D) scale into q (N*D multiply instead of N*N).
            xq = xq_ref[0]                                     # (TQ, Dp)
            wq = wqkv_ref[:, 0:dp]                             # (Dp, Dp)
            q = jnp.dot(xq, wq, preferred_element_type=jnp.float32)
            q_s[...] = q * scale
            m_s[...] = jnp.full(m_s.shape, -jnp.inf, dtype=m_s.dtype)
            l_s[...] = jnp.zeros(l_s.shape, dtype=l_s.dtype)
            acc_s[...] = jnp.zeros(acc_s.shape, dtype=acc_s.dtype)

        # Fused K/V projection: single MXU pass with a 2*Dp-wide RHS.
        xkv = xkv_ref[0]                                       # (TK, Dp)
        kv = jnp.dot(xkv, wqkv_ref[:, dp:3 * dp],              # (TK, 2*Dp)
                     preferred_element_type=jnp.float32)
        k = kv[:, 0:dp]                                        # (TK, Dp)
        v = kv[:, dp:2 * dp]                                   # (TK, Dp)

        # Scores: contract the last dims of q and k directly (no k.T copy).
        s = lax.dot_general(q_s[...], k, (((1,), (1,)), ((), ())),
                            preferred_element_type=jnp.float32)  # (TQ, TK)

        if mask_keys:
            col = lax.broadcasted_iota(jnp.int32, (tq, tk), 1) + ki * tk
            s = jnp.where(col < n_valid, s, -1e30)

        # Online (flash-style) softmax accumulation.
        m_new = jnp.maximum(m_s[...], s.max(axis=-1, keepdims=True))
        alpha = jnp.exp(m_s[...] - m_new)
        p = jnp.exp(s - m_new)
        l_s[...] = alpha * l_s[...] + p.sum(axis=-1, keepdims=True)
        acc_s[...] = alpha * acc_s[...] + jnp.dot(
            p.astype(v.dtype), v, preferred_element_type=jnp.float32)
        m_s[...] = m_new

        @pl.when(ki == nk - 1)
        def _finalize():
            o_ref[0] = (acc_s[...] *
                        pl.reciprocal(l_s[...], approx=True)).astype(o_ref.dtype)

    return kernel


def attention(x, wq, wk, wv, *, compute_dtype=None):
    """x: (B, N, D); wq/wk/wv: PyTorch-style (out, in) nn.Linear weights.

    compute_dtype: optionally cast x / W_qkv to e.g. jnp.bfloat16 on v6e/v7x
    (f32 accumulation is kept regardless).
    """
    B, N, D = x.shape
    scale = 1.0 / math.sqrt(D)

    # Lane-dense feature dim; sublane-friendly / tiled sequence dim.
    Dp = max(128, _round_up(D, 128))
    if N <= 512:
        TQ = TK = _round_up(N, 8)
    else:
        TQ = TK = 256          # fits comfortably in v7x's 64 MiB VMEM
    Np = _round_up(N, TQ)

    # Zero-pad to dense shapes (wrapper glue, not the hot path).
    xp = jnp.pad(x, ((0, 0), (0, Np - N), (0, Dp - D)))

    def prep_w(w):
        # nn.Linear computes x @ W.T -> store as (in, out), zero-padded.
        return jnp.pad(w.T, ((0, Dp - D), (0, Dp - D)))

    w_qkv = jnp.concatenate([prep_w(wq), prep_w(wk), prep_w(wv)], axis=1)

    if compute_dtype is not None:
        xp = xp.astype(compute_dtype)
        w_qkv = w_qkv.astype(compute_dtype)

    kernel = _make_kernel(n_valid=N, tq=TQ, tk=TK, dp=Dp, scale=scale,
                          mask_keys=(Np != N))

    nq = Np // TQ
    nk = Np // TK

    cost = pl.CostEstimate(
        flops=2 * B * (3 * Np * Dp * Dp + 2 * Np * Np * Dp),
        transcendentals=B * Np * Np,
        bytes_accessed=(xp.size + w_qkv.size) * xp.dtype.itemsize
        + B * Np * Dp * x.dtype.itemsize,
    )

    out = pl.pallas_call(
        kernel,
        out_shape=jax.ShapeDtypeStruct((B, Np, Dp), x.dtype),
        grid_spec=pltpu.PrefetchScalarGridSpec(
            num_scalar_prefetch=0,
            grid=(B, nq, nk),
            in_specs=[
                pl.BlockSpec((1, TQ, Dp), lambda b, qi, ki: (b, qi, 0)),  # query rows
                pl.BlockSpec((1, TK, Dp), lambda b, qi, ki: (b, ki, 0)),  # key/value rows
                pl.BlockSpec((Dp, 3 * Dp), lambda b, qi, ki: (0, 0)),     # fused W_qkv
            ],
            out_specs=pl.BlockSpec((1, TQ, Dp), lambda b, qi, ki: (b, qi, 0)),
            scratch_shapes=[
                pltpu.VMEM((TQ, Dp), jnp.float32),   # pre-scaled q
                pltpu.VMEM((TQ, 1), jnp.float32),    # running max
                pltpu.VMEM((TQ, 1), jnp.float32),    # running denom
                pltpu.VMEM((TQ, Dp), jnp.float32),   # output accumulator
            ],
        ),
        compiler_params=pltpu.CompilerParams(
            dimension_semantics=("parallel", "parallel", "arbitrary")),
        cost_estimate=cost,
    )(xp, xp, w_qkv)

    return out[:, :N, :D]


def attention_ref(x, wq, wk, wv):
    # Pure-JAX reference mirroring the PyTorch forward.
    q = x @ wq.T
    k = x @ wk.T
    v = x @ wv.T
    scale = 1.0 / math.sqrt(x.shape[-1])
    dist = jnp.einsum("bnd,bmd->bnm", q, k) * scale
    dist = jax.nn.softmax(dist, axis=-1)
    return jnp.einsum("bnm,bmd->bnd", dist, v)


if __name__ == "__main__":
    B, N, D = 2, 8, 32

    key = jax.random.PRNGKey(0)
    kx, kq, kk, kv = jax.random.split(key, 4)

    x = jax.random.normal(kx, (B, N, D), dtype=jnp.float32)
    bound = 1.0 / math.sqrt(D)
    wq = jax.random.uniform(kq, (D, D), jnp.float32, -bound, bound)
    wk = jax.random.uniform(kk, (D, D), jnp.float32, -bound, bound)
    wv = jax.random.uniform(kv, (D, D), jnp.float32, -bound, bound)

    out = attention(x, wq, wk, wv)
    jax.block_until_ready(out)

    ref = attention_ref(x, wq, wk, wv)
    assert out.shape == (B, N, D)
    # Tolerance relaxed because the softmax normalization uses the EUP
    # approximate reciprocal (pl.reciprocal(approx=True)); use approx=False
    # in the kernel to restore ~1e-5 agreement.
    assert jnp.allclose(out, ref, atol=1e-2, rtol=1e-2), (
        float(jnp.max(jnp.abs(out - ref))))

    print("KERNEL_OK")
</pallas_src>

<mosaic_0001>
module attributes {stable_mosaic.version = 11 : i64} {
  func.func @kernel(%arg0: i32, %arg1: i32, %arg2: i32, %arg3: memref<1x8x128xf32, #tpu.memory_space<vmem>>, %arg4: memref<1x8x128xf32, #tpu.memory_space<vmem>>, %arg5: memref<128x384xf32, #tpu.memory_space<vmem>>, %arg6: memref<1x8x128xf32, #tpu.memory_space<vmem>>, %arg7: memref<8x128xf32, #tpu.memory_space<vmem>>, %arg8: memref<8x1xf32, #tpu.memory_space<vmem>>, %arg9: memref<8x1xf32, #tpu.memory_space<vmem>>, %arg10: memref<8x128xf32, #tpu.memory_space<vmem>>) attributes {dimension_semantics = [#tpu.dimension_semantics<parallel>, #tpu.dimension_semantics<parallel>, #tpu.dimension_semantics<arbitrary>], iteration_bounds = array<i64: 2, 1, 1>, scalar_prefetch = 0 : i64, scratch_operands = 4 : i64, tpu.core_type = #tpu.core_type<tc>, window_params = [{transform_indices = @transform_0, window_bounds = array<i64: 1, 8, 128>}, {transform_indices = @transform_1, window_bounds = array<i64: 1, 8, 128>}, {pipeline_mode = #tpu.pipeline_mode<synchronous>, transform_indices = @transform_2, window_bounds = array<i64: 128, 384>}, {transform_indices = @transform_3, window_bounds = array<i64: 1, 8, 128>}]} {
    %c0_i32 = arith.constant 0 : i32
    %0 = arith.cmpi eq, %arg2, %c0_i32 : i32
    %1 = arith.extui %0 : i1 to i32
    %c0_i32_0 = arith.constant 0 : i32
    %2 = arith.cmpi ne, %1, %c0_i32_0 : i32
    scf.if %2 {
      %c0_26 = arith.constant 0 : index
      %c0_27 = arith.constant 0 : index
      %c0_28 = arith.constant 0 : index
      %37 = vector.load %arg3[%c0_26, %c0_27, %c0_28] : memref<1x8x128xf32, #tpu.memory_space<vmem>>, vector<1x8x128xf32>
      %38 = vector.shape_cast %37 : vector<1x8x128xf32> to vector<8x128xf32>
      %c0_29 = arith.constant 0 : index
      %c0_30 = arith.constant 0 : index
      %39 = vector.load %arg5[%c0_29, %c0_30] : memref<128x384xf32, #tpu.memory_space<vmem>>, vector<128x128xf32>
      %cst_31 = arith.constant dense<0.000000e+00> : vector<8x128xf32>
      %40 = tpu.matmul %38, %39, %cst_31 {dimension_numbers = #tpu.dot_dimension_numbers<[1], [0], [0], [1], [0, 0, 1, 1], [], []>} : vector<8x128xf32>, vector<128x128xf32>, vector<8x128xf32> -> vector<8x128xf32>
      %cst_32 = arith.constant 0.176776692 : f32
      %41 = vector.broadcast %cst_32 : f32 to vector<8x128xf32>
      %42 = arith.mulf %40, %41 : vector<8x128xf32>
      %c0_33 = arith.constant 0 : index
      %c0_34 = arith.constant 0 : index
      %43 = vector.load %arg7[%c0_33, %c0_34] : memref<8x128xf32, #tpu.memory_space<vmem>>, vector<8x128xf32>
      tpu.vector_store %arg7[%c0_33, %c0_34], %42 {strides = array<i32>} : memref<8x128xf32, #tpu.memory_space<vmem>>, vector<8x128xf32>,
      %cst_35 = arith.constant 0xFF800000 : f32
      %44 = vector.broadcast %cst_35 : f32 to vector<8x1xf32>
      %c0_36 = arith.constant 0 : index
      %c0_37 = arith.constant 0 : index
      %45 = vector.load %arg8[%c0_36, %c0_37] : memref<8x1xf32, #tpu.memory_space<vmem>>, vector<8x1xf32>
      tpu.vector_store %arg8[%c0_36, %c0_37], %44 {strides = array<i32>} : memref<8x1xf32, #tpu.memory_space<vmem>>, vector<8x1xf32>,
      %cst_38 = arith.constant 0.000000e+00 : f32
      %46 = vector.broadcast %cst_38 : f32 to vector<8x1xf32>
      %c0_39 = arith.constant 0 : index
      %c0_40 = arith.constant 0 : index
      %47 = vector.load %arg9[%c0_39, %c0_40] : memref<8x1xf32, #tpu.memory_space<vmem>>, vector<8x1xf32>
      tpu.vector_store %arg9[%c0_39, %c0_40], %46 {strides = array<i32>} : memref<8x1xf32, #tpu.memory_space<vmem>>, vector<8x1xf32>,
      %cst_41 = arith.constant 0.000000e+00 : f32
      %48 = vector.broadcast %cst_41 : f32 to vector<8x128xf32>
      %c0_42 = arith.constant 0 : index
      %c0_43 = arith.constant 0 : index
      %49 = vector.load %arg10[%c0_42, %c0_43] : memref<8x128xf32, #tpu.memory_space<vmem>>, vector<8x128xf32>
      tpu.vector_store %arg10[%c0_42, %c0_43], %48 {strides = array<i32>} : memref<8x128xf32, #tpu.memory_space<vmem>>, vector<8x128xf32>,
    } else {
    }
    %c0 = arith.constant 0 : index
    %c0_1 = arith.constant 0 : index
    %c0_2 = arith.constant 0 : index
    %3 = vector.load %arg4[%c0, %c0_1, %c0_2] : memref<1x8x128xf32, #tpu.memory_space<vmem>>, vector<1x8x128xf32>
    %4 = vector.shape_cast %3 : vector<1x8x128xf32> to vector<8x128xf32>
    %c0_3 = arith.constant 0 : index
    %c128 = arith.constant 128 : index
    %5 = vector.load %arg5[%c0_3, %c128] : memref<128x384xf32, #tpu.memory_space<vmem>>, vector<128x256xf32>
    %cst = arith.constant dense<0.000000e+00> : vector<8x256xf32>
    %6 = tpu.matmul %4, %5, %cst {dimension_numbers = #tpu.dot_dimension_numbers<[1], [0], [0], [1], [0, 0, 1, 1], [], []>} : vector<8x128xf32>, vector<128x256xf32>, vector<8x256xf32> -> vector<8x256xf32>
    %7 = vector.extract_strided_slice %6 {offsets = [0, 0], sizes = [8, 128], strides = [1, 1]} : vector<8x256xf32> to vector<8x128xf32>
    %8 = vector.extract_strided_slice %6 {offsets = [0, 128], sizes = [8, 128], strides = [1, 1]} : vector<8x256xf32> to vector<8x128xf32>
    %c0_4 = arith.constant 0 : index
    %c0_5 = arith.constant 0 : index
    %9 = vector.load %arg7[%c0_4, %c0_5] : memref<8x128xf32, #tpu.memory_space<vmem>>, vector<8x128xf32>
    %cst_6 = arith.constant dense<0.000000e+00> : vector<8x8xf32>
    %10 = tpu.matmul %9, %7, %cst_6 {dimension_numbers = #tpu.dot_dimension_numbers<[1], [1], [0], [0], [0, 0, 1, 0], [], []>} : vector<8x128xf32>, vector<8x128xf32>, vector<8x8xf32> -> vector<8x8xf32>
    %c0_7 = arith.constant 0 : index
    %c0_8 = arith.constant 0 : index
    %11 = vector.load %arg8[%c0_7, %c0_8] : memref<8x1xf32, #tpu.memory_space<vmem>>, vector<8x1xf32>
    %cst_9 = arith.constant dense<0xFF800000> : vector<8xf32>
    %12 = vector.multi_reduction <maximumf>, %10, %cst_9 [1] : vector<8x8xf32> to vector<8xf32>
    %13 = vector.shape_cast %12 : vector<8xf32> to vector<8x1xf32>
    %14 = arith.maximumf %11, %13 : vector<8x1xf32>
    %c0_10 = arith.constant 0 : index
    %c0_11 = arith.constant 0 : index
    %15 = vector.load %arg8[%c0_10, %c0_11] : memref<8x1xf32, #tpu.memory_space<vmem>>, vector<8x1xf32>
    %16 = arith.subf %15, %14 : vector<8x1xf32>
    %17 = math.exp %16 : vector<8x1xf32>
    %18 = vector.broadcast %14 : vector<8x1xf32> to vector<8x8xf32>
    %19 = arith.subf %10, %18 : vector<8x8xf32>
    %20 = math.exp %19 : vector<8x8xf32>
    %c0_12 = arith.constant 0 : index
    %c0_13 = arith.constant 0 : index
    %21 = vector.load %arg9[%c0_12, %c0_13] : memref<8x1xf32, #tpu.memory_space<vmem>>, vector<8x1xf32>
    %22 = arith.mulf %17, %21 : vector<8x1xf32>
    %cst_14 = arith.constant dense<0.000000e+00> : vector<8xf32>
    %23 = vector.multi_reduction <add>, %20, %cst_14 [1] : vector<8x8xf32> to vector<8xf32>
    %24 = vector.shape_cast %23 : vector<8xf32> to vector<8x1xf32>
    %25 = arith.addf %22, %24 : vector<8x1xf32>
    %c0_15 = arith.constant 0 : index
    %c0_16 = arith.constant 0 : index
    %26 = vector.load %arg9[%c0_15, %c0_16] : memref<8x1xf32, #tpu.memory_space<vmem>>, vector<8x1xf32>
    tpu.vector_store %arg9[%c0_15, %c0_16], %25 {strides = array<i32>} : memref<8x1xf32, #tpu.memory_space<vmem>>, vector<8x1xf32>,
    %c0_17 = arith.constant 0 : index
    %c0_18 = arith.constant 0 : index
    %27 = vector.load %arg10[%c0_17, %c0_18] : memref<8x128xf32, #tpu.memory_space<vmem>>, vector<8x128xf32>
    %28 = vector.broadcast %17 : vector<8x1xf32> to vector<8x128xf32>
    %29 = arith.mulf %28, %27 : vector<8x128xf32>
    %cst_19 = arith.constant dense<0.000000e+00> : vector<8x128xf32>
    %30 = tpu.matmul %20, %8, %cst_19 {dimension_numbers = #tpu.dot_dimension_numbers<[1], [0], [0], [1], [0, 0, 1, 1], [], []>} : vector<8x8xf32>, vector<8x128xf32>, vector<8x128xf32> -> vector<8x128xf32>
    %31 = arith.addf %29, %30 : vector<8x128xf32>
    %c0_20 = arith.constant 0 : index
    %c0_21 = arith.constant 0 : index
    %32 = vector.load %arg10[%c0_20, %c0_21] : memref<8x128xf32, #tpu.memory_space<vmem>>, vector<8x128xf32>
    tpu.vector_store %arg10[%c0_20, %c0_21], %31 {strides = array<i32>} : memref<8x128xf32, #tpu.memory_space<vmem>>, vector<8x128xf32>,
    %c0_22 = arith.constant 0 : index
    %c0_23 = arith.constant 0 : index
    %33 = vector.load %arg8[%c0_22, %c0_23] : memref<8x1xf32, #tpu.memory_space<vmem>>, vector<8x1xf32>
    tpu.vector_store %arg8[%c0_22, %c0_23], %14 {strides = array<i32>} : memref<8x1xf32, #tpu.memory_space<vmem>>, vector<8x1xf32>,
    %c0_i32_24 = arith.constant 0 : i32
    %34 = arith.cmpi eq, %arg2, %c0_i32_24 : i32
    %35 = arith.extui %34 : i1 to i32
    %c0_i32_25 = arith.constant 0 : i32
    %36 = arith.cmpi ne, %35, %c0_i32_25 : i32
    scf.if %36 {
      %c0_26 = arith.constant 0 : index
      %c0_27 = arith.constant 0 : index
      %37 = vector.load %arg10[%c0_26, %c0_27] : memref<8x128xf32, #tpu.memory_space<vmem>>, vector<8x128xf32>
      %c0_28 = arith.constant 0 : index
      %c0_29 = arith.constant 0 : index
      %38 = vector.load %arg9[%c0_28, %c0_29] : memref<8x1xf32, #tpu.memory_space<vmem>>, vector<8x1xf32>
      %39 = tpu.reciprocal %38 {approx = true} : vector<8x1xf32> -> vector<8x1xf32>
      %40 = vector.broadcast %39 : vector<8x1xf32> to vector<8x128xf32>
      %41 = arith.mulf %37, %40 : vector<8x128xf32>
      %c0_30 = arith.constant 0 : index
      %c0_31 = arith.constant 0 : index
      %c0_32 = arith.constant 0 : index
      %42 = vector.load %arg6[%c0_30, %c0_31, %c0_32] : memref<1x8x128xf32, #tpu.memory_space<vmem>>, vector<1x8x128xf32>
      %43 = vector.shape_cast %42 : vector<1x8x128xf32> to vector<8x128xf32>
      %44 = vector.shape_cast %41 : vector<8x128xf32> to vector<1x8x128xf32>
      tpu.vector_store %arg6[%c0_30, %c0_31, %c0_32], %44 {strides = array<i32>} : memref<1x8x128xf32, #tpu.memory_space<vmem>>, vector<1x8x128xf32>,
    } else {
    }
    return
  }
  func.func @transform_0(%arg0: i32, %arg1: i32, %arg2: i32) -> (i32, i32, i32) {
    %c0_i32 = arith.constant 0 : i32
    %c0_i32_0 = arith.constant 0 : i32
    return %arg0, %arg1, %c0_i32 : i32, i32, i32
  }
  func.func @transform_1(%arg0: i32, %arg1: i32, %arg2: i32) -> (i32, i32, i32) {
    %c0_i32 = arith.constant 0 : i32
    %c0_i32_0 = arith.constant 0 : i32
    return %arg0, %arg2, %c0_i32 : i32, i32, i32
  }
  func.func @transform_2(%arg0: i32, %arg1: i32, %arg2: i32) -> (i32, i32) {
    %c0_i32 = arith.constant 0 : i32
    %c0_i32_0 = arith.constant 0 : i32
    %c0_i32_1 = arith.constant 0 : i32
    return %c0_i32, %c0_i32_0 : i32, i32
  }
  func.func @transform_3(%arg0: i32, %arg1: i32, %arg2: i32) -> (i32, i32, i32) {
    %c0_i32 = arith.constant 0 : i32
    %c0_i32_0 = arith.constant 0 : i32
    return %arg0, %arg1, %c0_i32 : i32, i32, i32
  }
}

</mosaic_0001>

<bundles_post_ra>
// kernel: tpu_custom_call.1
= control target key start
LH: loop header
LB: loop body
LE: loop exit
PB: predicated region body
PF: predicated region fallthrough
CT: control target
= control target key end

     0   :  { %s1513_s0 = inlined_call_operand.hbm [shape: f32[2,8,128], index: 0, kind: input, shape index: {}]   ;;  %s1514_s1 = inlined_call_operand.hbm [shape: f32[2,8,128], index: 1, kind: input, shape index: {}]   ;;  %s1515_s2 = inlined_call_operand.hbm [shape: f32[128,384], index: 2, kind: input, shape index: {}]   ;;  %s1516_s3 = inlined_call_operand.hbm [shape: f32[2,8,128], index: 3, kind: output, shape index: {}]  }
   0x1   :  { %1522 = sst [smem:[#allocation18_spill]] %s1515_s2 }
   0x2   :  { %8 = vsyncpa [#allocation7], 0 }
   0x3   :  { %10 = vsyncpa [#allocation7 + $0x1], 0 }
   0x4   :  { %11 = vsyncpa [#allocation10], 0 }
   0x5   :  { %13 = vsyncpa [#allocation10 + $0x1], 0 }
   0x6   :  { %14 = vsyncpa [#allocation8], 0 }
   0x7   :  { %16 = vsyncpa [#allocation8 + $0x1], 0  ;;  %s1233_s12 = smov 0   ;;  %s1235_s13 = smov 0  }
   0x8   :  { %s1237_s14 = smov 0   ;;  %s1239_s15 = smov 0  }
   0x9   :  { %s1241_s16 = smov 0   ;;  %s1243_s17 = smov 0  }
   0xa LB: > { %s1264_s18 = sadd.s32 4294967295, %s1200_s17   ;;  %s789_s19 = sadd.s32 4294967294, %s1200_s17   ;;  %s1200_s17 = sphi %s1243_s17, %s22_s17   ;;  %s1196_s16 = sphi %s1241_s16, %s1545_s16   ;;  %s1192_s15 = sphi %s1239_s15, %s1544_s15   ;;  %s1188_s14 = sphi %s1237_s14, %s1543_s14   ;;  %s1184_s13 = sphi %s1235_s13, %s1542_s13   ;;  %s1180_s12 = sphi %s1233_s12, %s1541_s12  }
   0xb   : > { %p63_p0 = scmp.ne.s32.totalorder %s1184_s13, %s1180_s12  ;;  %p1517_p1 = scmp.eq.s32.totalorder %s1264_s18, 0 }
   0xc   : > { %p144_p3 = scmp.eq.s32.totalorder %s789_s19, 1  ;;  %p790_p5 = scmp.ge.s32.totalorder %s1200_s17, 1 }
   0xd   : > { %p1273_p4 = por %p1517_p1, %p63_p0  ;;  %p151_p7 = scmp.lt.s32.totalorder %s1200_s17, 3 }
   0xe   : > { %p1278_p6 = por %p144_p3, %p63_p0  ;;  %s1202_s23 = smov [#allocation11]  }
   0xf   : > { %s1523_s20 = scalar_select %p1273_p4, 1, 0 }
  0x10   : > { %s1524_s21 = scalar_select %p1278_p6, 1, 0 }
  0x11   : > { %p1283_p8 = pnand %p790_p5, %p151_p7  ;;  %s163_s24 = sshll.u32 %s1202_s23, 4  ;;  %s164_s24 = int_to_ptr.vmem [resolvable:$true] %s163_s24 }
  0x12   : > { %s41_s26 = sadd.s32 1, %s1196_s16  ;;  %s1527_s2 = sld [smem:[#allocation18_spill]] }
  0x13   : > { %s1525_s22 = scalar_select %p1283_p8, 1, 0 }
  0x14   : > { %p939_p9 = pneg %p1283_p8 }
  0x16   : > { %p1292_p11 = pnand %p939_p9, %p1517_p1 }
  0x18   : > { %s1022_s29 = scalar_lea.hbm %s1527_s2, 6144  ;;  %p1024_p13 = pneg %p1292_p11 }
  0x19   : > { %p1023_p12 = scmp.ne.s32.totalorder %s1527_s2, %s1022_s29  ;;  %p1029_p5 = scmp.lt.u32.totalorder %s1022_s29, %s1527_s2 }
  0x1b   : > { %p1025_p0 = pnand %p1024_p13, %p1023_p12 }
  0x1d   : > { %p1026_p3 = pneg %p1025_p0 }
  0x1f   : > { %p1031_p7 = pnand %p1029_p5, %p1026_p3 }
  0x21   : > { %1034 = shalt.err (!%p1031_p7)
}
  0x22   : > { %s1035_s7 = scalar_lea.vmem %s164_s24, 6144  ;;  %p1043_p2 = scmp.lt.s32.totalorder %s164_s24, %s164_s24 }
  0x23   : > { %p1036_p9 = scmp.ne.s32.totalorder %s164_s24, %s1035_s7  ;;  %p1044_p6 = scmp.lt.s32.totalorder %s1035_s7, %s1035_s7 }
  0x25   : > { %p1038_p10 = pnand %p1036_p9, %p1024_p13  ;;  %p1045_p4 = por %p1044_p6, %p1043_p2 }
  0x27   : > { %p1039_p1 = pneg %p1038_p10 }
  0x29   : > { %p1046_p8 = pnand %p1045_p4, %p1039_p1 }
  0x2b   : > { %1049 = shalt.err (!%p1046_p8)
}
  0x2c   : > { %s1203_s8 = smov 384   ;;  %s1204_s9 = smov 24  }
  0x2d   : > { %942 = dma.hbm_to_vmem [thread:$0]  (!%p1292_p11), %s1527_s2, 6144, %s164_s24, [#allocation10], %s1203_s8, %s1203_s8, %s1204_s9  }
  0x2e   : > { %p43_p1 = scmp.ge.s32.totalorder %s41_s26, 2  ;;  %s50_s19 = sadd.s32 1, %s1188_s14 }
  0x2f   : > { %p57_p2 = scmp.ne.s32.totalorder %s1188_s14, %s1184_s13  ;;  %p58_p4 = scmp.eq.s32.totalorder %s1200_s17, 0 }
  0x30   : > { %s1547_s26 = smov (%p43_p1, %s41_s26), 0  ;;  %p1530_p8 = scmp.eq.s32.totalorder %s1264_s18, 1 }
  0x31   : > { %1528 = sst [smem:[#allocation17_spill]] %s1547_s26  ;;  %p1319_p6 = por %p58_p4, %p57_p2 }
  0x32   : > { %p1325_p10 = por %p1530_p8, %p57_p2  ;;  %s45_s27 = ssub.s32 %s1196_s16, %s1547_s26 }
  0x33   : > { %p955_p11 = scmp.lt.s32.totalorder %s1200_s17, 2  ;;  %p48_p12 = scmp.eq.s32.totalorder %s45_s27, 0 }
  0x34   : > { %s1531_s25 = scalar_select %p1325_p10, 1, 0 }
  0x35   : > { %s177_s24 = sand.u32 1, %s1188_s14   ;;  %s794_s30 = sshll.u32 %s1196_s16, 7 }
  0x36   : > { %s1333_s28 = sshll.u32 %s177_s24, 3  ;;  %s1342_s6 = scalar_lea.hbm %s1513_s0, %s794_s30 }
  0x37   : > { %s1336_s29 = scalar_select %p48_p12, %s1188_s14, %s50_s19  }
  0x38   : > { %s181_s7 = scalar_lea.vmem [#allocation6], %s1333_s28  ;;  %p1349_p13 = pnand %p955_p11, %p1319_p6 }
  0x39   : > { %s189_s8 = sshll.u32 %s181_s7, 4  ;;  %s1356_s19 = scalar_lea.hbm %s1514_s1, %s794_s30  ;;  %s1345_s8 = int_to_ptr.vmem [resolvable:$true] %s189_s8 }
  0x3a   : > { %s196_s27 = sand.u32 1, %s1200_s17   ;;  %s178_s4 = scalar_lea.sflag [#allocation7], %s177_s24 }
  0x3b   : > { %s1050_s5 = scalar_lea.hbm %s1342_s6, 128  ;;  %p1052_p3 = pneg %p1349_p13 }
  0x3c   : > { %p1051_p0 = scmp.ne.s32.totalorder %s1342_s6, %s1050_s5  ;;  %s1055_s2 = scalar_lea.hbm %s1513_s0, 256 }
  0x3d   : > { %p1056_p9 = scmp.lt.u32.totalorder %s1342_s6, %s1513_s0  ;;  %p1057_p1 = scmp.lt.u32.totalorder %s1055_s2, %s1050_s5 }
  0x3e   : > { %p1053_p5 = pnand %p1052_p3, %p1051_p0  ;;  %p1059_p4 = scmp.lt.u32.totalorder %s1050_s5, %s1342_s6 }
  0x3f   : > { %p1058_p2 = por %p1057_p1, %p1056_p9 }
  0x40   : > { %p1054_p7 = pneg %p1053_p5 }
  0x41   : > { %p1060_p6 = por %p1059_p4, %p1058_p2 }
  0x43   : > { %p1061_p8 = pnand %p1060_p6, %p1054_p7 }
  0x45   : > { %1064 = shalt.err (!%p1061_p8)
}
  0x46   : > { %s1065_s24 = scalar_lea.vmem %s1345_s8, 128  ;;  %s1205_s30 = smov [#allocation6]  }
  0x47   : > { %p1066_p11 = scmp.ne.s32.totalorder %s1345_s8, %s1065_s24  ;;  %s1070_s11 = sshll.u32 %s1205_s30, 4  ;;  %s1071_s11 = int_to_ptr.vmem [resolvable:$false] %s1070_s11 }
  0x48   : > { %s1072_s26 = scalar_lea.vmem %s1071_s11, 256  ;;  %p1073_p5 = scmp.lt.s32.totalorder %s1345_s8, %s1071_s11 }
  0x49   : > { %p1068_p12 = pnand %p1066_p11, %p1052_p3  ;;  %p1074_p9 = scmp.lt.s32.totalorder %s1072_s26, %s1065_s24 }
  0x4b   : > { %p1069_p0 = pneg %p1068_p12  ;;  %p1075_p1 = por %p1074_p9, %p1073_p5 }
  0x4d   : > { %p1076_p2 = pnand %p1075_p1, %p1069_p0 }
  0x4f   : > { %1079 = shalt.err (!%p1076_p2)
}
  0x50   : > { %946 = dma.hbm_to_vmem [thread:$0]  (!%p1349_p13), %s1342_s6, 128, %s1345_s8, %s178_s4  }
  0x51   : > { %s200_s2 = scalar_lea.vmem [#allocation9], %s1333_s28  ;;  %s197_s23 = scalar_lea.sflag [#allocation10], %s196_s27 }
  0x52   : > { %s208_s5 = sshll.u32 %s200_s2, 4  ;;  %s1080_s7 = scalar_lea.hbm %s1356_s19, 128  ;;  %s209_s5 = int_to_ptr.vmem [resolvable:$true] %s208_s5 }
  0x53   : > { %p1081_p7 = scmp.ne.s32.totalorder %s1356_s19, %s1080_s7  ;;  %s1085_s30 = scalar_lea.hbm %s1514_s1, 256 }
  0x54   : > { %p1086_p8 = scmp.lt.u32.totalorder %s1356_s19, %s1514_s1  ;;  %p1087_p11 = scmp.lt.u32.totalorder %s1085_s30, %s1080_s7 }
  0x55   : > { %p1083_p4 = pnand %p1081_p7, %p1052_p3  ;;  %p1089_p0 = scmp.lt.u32.totalorder %s1080_s7, %s1356_s19 }
  0x56   : > { %p1088_p12 = por %p1087_p11, %p1086_p8 }
  0x57   : > { %p1084_p6 = pneg %p1083_p4 }
  0x58   : > { %p1090_p5 = por %p1089_p0, %p1088_p12 }
  0x5a   : > { %p1091_p9 = pnand %p1090_p5, %p1084_p6 }
  0x5c   : > { %1094 = shalt.err (!%p1091_p9)
}
  0x5d   : > { %s1095_s28 = scalar_lea.vmem %s209_s5, 128  ;;  %s1206_s6 = smov [#allocation9]  }
  0x5e   : > { %p1096_p1 = scmp.ne.s32.totalorder %s209_s5, %s1095_s28  ;;  %s1100_s8 = sshll.u32 %s1206_s6, 4  ;;  %s1101_s8 = int_to_ptr.vmem [resolvable:$false] %s1100_s8 }
  0x5f   : > { %s1102_s27 = scalar_lea.vmem %s1101_s8, 256  ;;  %p1103_p4 = scmp.lt.s32.totalorder %s209_s5, %s1101_s8 }
  0x60   : > { %p1098_p2 = pnand %p1096_p1, %p1052_p3  ;;  %p1104_p10 = scmp.lt.s32.totalorder %s1102_s27, %s1095_s28 }
  0x62   : > { %p1099_p7 = pneg %p1098_p2  ;;  %p1105_p8 = por %p1104_p10, %p1103_p4 }
  0x64   : > { %p1106_p11 = pnand %p1105_p8, %p1099_p7 }
  0x66   : > { %1109 = shalt.err (!%p1106_p11)
}
  0x67   : > { %949 = dma.hbm_to_vmem [thread:$0]  (!%p1349_p13), %s1356_s19, 128, %s209_s5, %s197_s23  }
  0x68   : > { %p1533_p6 = scmp.ne.s32.totalorder %s1525_s22, 0 }
  0x69   : > { %s1409_s4 = sand.u32 (!%p1533_p6), 1, %s1184_s13   ;;  %p1534_p10 = scmp.ne.s32.totalorder (!%p1533_p6), %s1523_s20, 0 }
  0x6a   : > { %217 = sbr.rel (%p1533_p6) target bundleno = 1178 (0x49a), region = 32  ;;  %s1412_s2 = sshll.u32 (!%p1533_p6), %s1409_s4, 3 }
  0x6b   : > { %s220_s7 = scalar_lea.sflag (!%p1533_p6), [#allocation7], %s1409_s4  ;;  %s223_s10 = scalar_lea.vmem (!%p1533_p6), [#allocation6], %s1412_s2 }
  0x71   : > { %1163 = dma.done.wait (%p1534_p10), %s220_s7, 128  }
  0x72   : > { %1165 = vsyncadd (%p1534_p10), %s220_s7, 4294967168  ;;  %s228_s22 = sand.u32 1, %s1264_s18   ;;  %s232_s19 = scalar_lea.vmem [#allocation9], %s1412_s2 }
  0x73   : > { %s229_s9 = scalar_lea.sflag [#allocation10], %s228_s22 }
  0x74   : > { %1167 = dma.done.wait (%p1534_p10), %s229_s9, 128  }
  0x75   : > { %1169 = vsyncadd (%p1534_p10), %s229_s9, 4294967168  ;;  %p1535_p13 = scmp.eq.s32.totalorder %s1264_s18, 0 }
  0x77   : > { %1171 = dma.done.wait (%p1535_p13), [#allocation10], 6144   ;;  %p1536_p3 = pmov %p1535_p13 }
  0x78   : > { %v1207_v0 = vmov 0.0|0.0   ;;  %v1208_v1 = vmov 0.0   ;;  %vm1209_vm0 = vmmov 0   ;;  %v363_v2 = vld [vmem:[#allocation11 + $0x10] sm:$0xff]  ;;  %v365_v3 = vld [vmem:[#allocation11 + $0x28] sm:$0xff]  ;;  %v364_v6 = vld [vmem:[#allocation11 + $0x20] sm:$0xff] }
  0x79   : > { %1173 = vsyncadd (%p1536_p3), [#allocation10], 4294961152  ;;  %873 = vmatprep.subr.bf16.mxu0 %v1207_v0  ;;  %458 = vmatprep.mubr.f32.mxu1 %v1208_v1  ;;  %v362_v4 = vld [vmem:[#allocation11 + $0x8] sm:$0xff]  ;;  %v897_v5 = vpack.c.bf16 %v365_v3, %v363_v2  ;;  %v269_v7 = vld [vmem:[#allocation11] sm:$0xff]  ;;  %vm357_vm1 = vcmask 7168   ;;  %vm537_vm2 = vcmask 64512  }
  0x7a   : > { %860 = vmatprep.mubr.msk.f32.mxu0 %vm1209_vm0, %v1208_v1  ;;  %v270_v8 = vld [vmem:[#allocation11 + $0x18] sm:$0xff]  ;;  %v899_v9 = vpack.c.bf16 %v364_v6, %v362_v4  ;;  %v367_v11 = vld [vmem:[#allocation11 + $0x40] sm:$0xff]  ;;  %v368_v15 = vld [vmem:[#allocation11 + $0x50] sm:$0xff]  ;;  %359 = vst.msk [vmem:[#allocation4] sm:$0xff] %vm357_vm1, %v1208_v1  ;;  %s804_s18 = sshll.u32 %s1192_s15, 7  ;;  %s263_s20 = scalar_lea.vmem [#allocation12], %s1412_s2 }
  0x7b   : > { %v874_v10 = vpack.c.bf16 %v270_v8, %v269_v7  ;;  %v369_v12 = vld [vmem:[#allocation11 + $0x58] sm:$0xff]  ;;  %898 = vmatprep.subr.bf16.mxu1 %v897_v5  ;;  %v271_v16 = vld [vmem:[#allocation11 + $0x30] sm:$0xff]  ;;  %v272_v17 = vld [vmem:[#allocation11 + $0x48] sm:$0xff]  ;;  %s672_s5 = sshll.u32 %s263_s20, 4  ;;  %s1464_s30 = scalar_lea.hbm %s1516_s3, %s804_s18  ;;  %s1466_s5 = int_to_ptr.vmem [resolvable:$true] %s672_s5 }
  0x7c   : > { %v366_v13 = vld [vmem:[#allocation11 + $0x38] sm:$0xff]  ;;  %v901_v14 = vpack.c.bf16 %v369_v12, %v367_v11  ;;  %900 = vmatpush1.bf16.msra.mxu1 %v899_v9  ;;  %v877_v19 = vpack.c.bf16 %v272_v17, %v271_v16  ;;  %v371_v20 = vld [vmem:[#allocation11 + $0x70] sm:$0xff]  ;;  %v373_v21 = vld [vmem:[#allocation11 + $0x88] sm:$0xff]  ;;  %s658_s11 = scalar_lea.sflag [#allocation8], %s1409_s4  ;;  %s1110_s26 = scalar_lea.vmem %s1466_s5, 128 }
  0x7d   : > { %875 = vmatpush3.bf16.msra.mxu0 %v874_v10  ;;  %v903_v18 = vpack.c.bf16 %v368_v15, %v366_v13  ;;  %v370_v22 = vld [vmem:[#allocation11 + $0x68] sm:$0xff]  ;;  %v905_v23 = vpack.c.bf16 %v373_v21, %v371_v20  ;;  %v372_v24 = vld [vmem:[#allocation11 + $0x80] sm:$0xff]  ;;  %v274_v26 = vld [vmem:[#allocation11 + $0x78] sm:$0xff]  ;;  %p1111_p12 = scmp.ne.s32.totalorder %s1466_s5, %s1110_s26  ;;  %p1537_p0 = scmp.ne.s32.totalorder %s1531_s25, 0 }
  0x7e   : > { %902 = vmatprep.subr.bf16.mxu1 %v901_v14  ;;  %876 = vmatprep.subr.bf16.mxu0 %v1207_v0  ;;  %v273_v25 = vld [vmem:[#allocation11 + $0x60] sm:$0xff]  ;;  %v377_v28 = vld [vmem:[#allocation11 + $0xb8] sm:$0xff]  ;;  %v907_v29 = vpack.c.bf16 %v372_v24, %v370_v22  ;;  %v376_v33 = vld [vmem:[#allocation11 + $0xb0] sm:$0xff]  ;;  %v1211_v22 = vmov 0   ;;  %s1212_s15 = smov [#allocation12]  }
  0x7f   : > { %v375_v27 = vld [vmem:[#allocation11 + $0xa0] sm:$0xff]  ;;  %v880_v30 = vpack.c.bf16 %v274_v26, %v273_v25  ;;  %v374_v31 = vld [vmem:[#allocation11 + $0x98] sm:$0xff]  ;;  %v275_v34 = vld [vmem:[#allocation11 + $0x90] sm:$0xff]  ;;  %1014 = vset.pattern.permute.xlu0 %v1211_v22  ;;  %1015 = vset.pattern.permute.xlu1 %v1211_v22  ;;  %p1112_p5 = pnand %p1111_p12, %p1537_p0  ;;  %s1114_s28 = sshll.u32 %s1212_s15, 4  ;;  %s1115_s28 = int_to_ptr.vmem [resolvable:$false] %s1114_s28 }
  0x80   : > { %904 = vmatpush1.bf16.msra.mxu1 %v903_v18  ;;  %v909_v32 = vpack.c.bf16 %v377_v28, %v375_v27  ;;  %v276_v35 = vld [vmem:[#allocation11 + $0xa8] sm:$0xff]  ;;  %v379_v36 = vld [vmem:[#allocation11 + $0xd0] sm:$0xff]  ;;  %v911_v38 = vpack.c.bf16 %v376_v33, %v374_v31  ;;  %v380_v42 = vld [vmem:[#allocation11 + $0xe0] sm:$0xff]  ;;  %v1210_v18 = vmov -inf   ;;  %s1116_s6 = scalar_lea.vmem %s1115_s28, 256  ;;  %p1117_p1 = scmp.lt.s32.totalorder %s1466_s5, %s1115_s28 }
  0x81   : > { %878 = vmatpush3.bf16.msra.mxu0 %v877_v19  ;;  %906 = vmatprep.subr.bf16.mxu1 %v905_v23  ;;  %v381_v37 = vld [vmem:[#allocation11 + $0xe8] sm:$0xff]  ;;  %v883_v39 = vpack.c.bf16 %v276_v35, %v275_v34  ;;  %v277_v43 = vld [vmem:[#allocation11 + $0xc0] sm:$0xff]  ;;  %v278_v44 = vld [vmem:[#allocation11 + $0xd8] sm:$0xff]  ;;  %358 = vst.msk [vmem:[#allocation3] sm:$0xff] %vm357_vm1, %v1210_v18  ;;  %p1113_p9 = pneg %p1112_p5  ;;  %p1118_p2 = scmp.lt.s32.totalorder %s1116_s6, %s1110_s26 }
  0x82   : > { %879 = vmatprep.subr.bf16.mxu0 %v1207_v0  ;;  %v378_v40 = vld [vmem:[#allocation11 + $0xc8] sm:$0xff]  ;;  %v913_v41 = vpack.c.bf16 %v381_v37, %v379_v36  ;;  %v383_v45 = vld [vmem:[#allocation11 + $0x100] sm:$0xff]  ;;  %v385_v46 = vld [vmem:[#allocation11 + $0x118] sm:$0xff]  ;;  %v886_v48 = vpack.c.bf16 %v278_v44, %v277_v43 }
  0x83   : > { %v915_v47 = vpack.c.bf16 %v380_v42, %v378_v40  ;;  %v382_v49 = vld [vmem:[#allocation11 + $0xf8] sm:$0xff]  ;;  %v917_v50 = vpack.c.bf16 %v385_v46, %v383_v45  ;;  %v384_v51 = vld [vmem:[#allocation11 + $0x110] sm:$0xff]  ;;  %v280_v53 = vld [vmem:[#allocation11 + $0x108] sm:$0xff]  ;;  %p1119_p7 = por %p1118_p2, %p1117_p1 }
  0x84   : > { %908 = vmatpush1.bf16.msra.mxu1 %v907_v29  ;;  %v279_v52 = vld [vmem:[#allocation11 + $0xf0] sm:$0xff]  ;;  %v389_v55 = vld [vmem:[#allocation11 + $0x148] sm:$0xff]  ;;  %v919_v56 = vpack.c.bf16 %v384_v51, %v382_v49  ;;  %v388_v60 = vld [vmem:[#allocation11 + $0x140] sm:$0xff] }
  0x85   : > { %881 = vmatpush3.bf16.msra.mxu0 %v880_v30  ;;  %910 = vmatprep.subr.bf16.mxu1 %v909_v32  ;;  %v387_v54 = vld [vmem:[#allocation11 + $0x130] sm:$0xff]  ;;  %v889_v57 = vpack.c.bf16 %v280_v53, %v279_v52  ;;  %v386_v58 = vld [vmem:[#allocation11 + $0x128] sm:$0xff]  ;;  %v281_v61 = vld [vmem:[#allocation11 + $0x120] sm:$0xff]  ;;  %p1120_p4 = pnand %p1119_p7, %p1113_p9 }
  0x86   : > { %882 = vmatprep.subr.bf16.mxu0 %v1207_v0  ;;  %v921_v59 = vpack.c.bf16 %v389_v55, %v387_v54  ;;  %v282_v62 = vld [vmem:[#allocation11 + $0x138] sm:$0xff]  ;;  %v391_v63 = vld [vmem:[#allocation11 + $0x160] sm:$0xff]  ;;  %v923_v3 = vpack.c.bf16 %v388_v60, %v386_v58  ;;  %v392_v7 = vld [vmem:[#allocation11 + $0x170] sm:$0xff] }
  0x87   : > { %v393_v2 = vld [vmem:[#allocation11 + $0x178] sm:$0xff]  ;;  %v892_v4 = vpack.c.bf16 %v282_v62, %v281_v61  ;;  %v283_v8 = vld [vmem:[#allocation11 + $0x150] sm:$0xff]  ;;  %v284_v9 = vld [vmem:[#allocation11 + $0x168] sm:$0xff] }
  0x88   : > { %912 = vmatpush1.bf16.msra.mxu1 %v911_v38  ;;  %v390_v5 = vld [vmem:[#allocation11 + $0x158] sm:$0xff]  ;;  %v925_v6 = vpack.c.bf16 %v393_v2, %v391_v63  ;;  %v895_v11 = vpack.c.bf16 %v284_v9, %v283_v8  ;;  %v268_v13 = vld [vmem:[%s223_s10] sm:$0xff]  ;;  %v536_v23 = vld [vmem:[#allocation3] sm:$0xff] }
  0x89   : > { %884 = vmatpush3.bf16.msra.mxu0 %v883_v39  ;;  %914 = vmatprep.subr.bf16.mxu1 %v913_v41  ;;  %v927_v10 = vpack.c.bf16 %v392_v7, %v390_v5  ;;  %v361_v12 = vld [vmem:[%s232_s19] sm:$0xff] }
  0x8a   : > { %885 = vmatprep.subr.bf16.mxu0 %v1207_v0  ;;  %v553_v33 = vld [vmem:[#allocation4] sm:$0xff] }
  0x8c   : > { %916 = vmatpush1.bf16.msra.mxu1 %v915_v47 }
  0x8d   : > { %887 = vmatpush3.bf16.msra.mxu0 %v886_v48  ;;  %918 = vmatprep.subr.bf16.mxu1 %v917_v50 }
  0x8e   : > { %888 = vmatprep.subr.bf16.mxu0 %v1207_v0 }
  0x90   : > { %920 = vmatpush1.bf16.msra.mxu1 %v919_v56 }
  0x91   : > { %890 = vmatpush3.bf16.msra.mxu0 %v889_v57  ;;  %922 = vmatprep.subr.bf16.mxu1 %v921_v59 }
  0x92   : > { %891 = vmatprep.subr.bf16.mxu0 %v1207_v0 }
  0x94   : > { %924 = vmatpush1.bf16.msra.mxu1 %v923_v3 }
  0x95   : > { %893 = vmatpush3.bf16.msra.mxu0 %v892_v4  ;;  %926 = vmatprep.subr.bf16.mxu1 %v925_v6 }
  0x96   : > { %894 = vmatprep.subr.bf16.mxu0 %v1207_v0 }
  0x98   : > { %928 = vmatpush1.bf16.msra.mxu1 %v927_v10 }
  0x99   : > { %896 = vmatpush3.bf16.msra.mxu0 %v895_v11  ;;  %868 = vmatprep.subr.mxu1 %v1208_v1 }
  0x9a   : > { %863 = vmatprep.subr.mxu0 %v1208_v1 }
  0x9b   : > { %459 = vmatmul.mubr.f32.vlgmr.msra.gmra.mrb[0].mxu1 %v361_v12 }
  0x9c   : > { %861 = vmatmul.mubr.f32.vlgmr.msra.gmra.mrb[0].mxu0 %v268_v13  ;;  %870 = vmatprep.mubr.msk.f32.mxu1 %vm1209_vm0, %v1208_v1 }
  0x9d   : > { %865 = vmatprep.mubr.msk.f32.mxu0 %vm1209_vm0, %v1208_v1 }
 0x16e   : > { %v460_v14 = vpop.f32.mrb[0].mxu1 }
 0x16f   : > { %v351_v0 = vpop.f32.mrb[0].mxu0  ;;  %v462_v16 = vpop.f32.mrb[1].mxu1  ;;  %864 = vmatpush3.xpose.msra.mxu0 %v460_v14 }
 0x170   : > { %v355_v15 = vmul.f32 0.17677669, %v351_v0  ;;  %v862_v17 = vpop.f32.mrb[1].mxu0  ;;  %869 = vmatpush3.msra.mxu1 %v462_v16 }
 0x172   : > { %866 = vmatmul.mubr.f32.vlgmr.msra.gmra.mrb[2].mxu0 %v355_v15 }
 0x245   : > { %v532_v19 = vpop.f32.mrb[2].mxu0 }
 0x246   : > { %v867_v20 = vpop.f32.mrb[3].mxu0  ;;  %v538_v21 = vsel %vm537_vm2, %v532_v19, -inf }
 0x247   : > { %539 = vmax.xlane.f32.xlu0 %v538_v21 }
 0x2d4   : > { %v540_v24 = vpop.xlane.xlu0 %539 }
 0x2d5   : > { %v541_v25 = vmax.f32 %v536_v23, %v540_v24 }
 0x2d7   : > { %v542_v26 = vsub.f32 %v536_v23, %v541_v25  ;;  %643 = vst.msk [vmem:[#allocation3] sm:$0xff] %vm357_vm1, %v541_v25  ;;  %547 = vperm.xlu0 %1014, %v541_v25  }
 0x2d9   : > { %v543_v31 = vmul.f32 1.442695, %v542_v26 }
 0x356   : > { %v548_v27 = vpop.permute.xlu0 %547 }
 0x357   : > { %v550_v28 = vsub.f32 %v532_v19, %v548_v27 }
 0x359   : > { %v551_v29 = vmul.f32 1.442695, %v550_v28 }
 0x35b   : > { %1016 = vpow2.f32 %v551_v29 }
 0x35c   : > { %1018 = vpow2.f32 %v543_v31 }
 0x365   : > { %v1017_v1 = vpop.eup %1016 }
 0x366   : > { %871 = vmatmul.mubr.msk.f32.vlgmr.msra.gmra.mrb[2].mxu1 %vm537_vm2, %v1017_v1  ;;  %v555_v30 = vsel %vm537_vm2, %v1017_v1, 0.0  ;;  %v1019_v32 = vpop.eup %1018 }
 0x367   : > { %556 = vadd.xlane.f32.xlu1 %v555_v30  ;;  %v554_v34 = vmul.f32 %v1019_v32, %v553_v33 }
 0x378   : > { %564 = vperm.xlu1 %1015, %v1019_v32  }
 0x3f4   : > { %v557_v35 = vpop.xlane.xlu1 %556 }
 0x3f5   : > { %v558_v36 = vadd.f32 %v557_v35, %v554_v34 }
 0x3f7   : > { %560 = vst.msk [vmem:[#allocation4] sm:$0xff] %vm357_vm1, %v558_v36 }
 0x3f8   : > { %v565_v41 = vpop.permute.xlu1 %564 }
 0x3f9   : > { %v567_v42 = vmul.f32 0.0, %v565_v41 }
 0x3fe   : > { %v648_v37 = vld [vmem:[#allocation4] sm:$0xff] }
 0x3ff   : > { %1020 = vrcp.f32 %v648_v37 }
 0x409   : > { %v1021_v38 = vpop.eup %1020 }
 0x40a   : > { %652 = vperm.xlu1 %1015, %v1021_v38  }
 0x439   : > { %v637_v39 = vpop.f32.mrb[2].mxu1 }
 0x43a   : > { %v872_v40 = vpop.f32.mrb[3].mxu1  ;;  %v641_v43 = vadd.f32 %v637_v39, %v567_v42 }
 0x489   : > { %v653_v44 = vpop.permute.xlu1 %652 }
 0x48a   : > { %v655_v45 = vmul.f32 %v653_v44, %v641_v43 }
 0x48c   : > { %656 = vst [vmem:[%s263_s20] sm:$0xff] %v655_v45 }
 0x48d   : > { %1123 = shalt.err (!%p1120_p4)
}
 0x48e   : > { %s1124_s8 = scalar_lea.hbm %s1464_s30, 128  ;;  %s1128_s2 = scalar_lea.hbm %s1516_s3, 256 }
 0x48f   : > { %p1125_p8 = scmp.ne.s32.totalorder %s1464_s30, %s1124_s8  ;;  %p1129_p10 = scmp.lt.u32.totalorder %s1464_s30, %s1516_s3 }
 0x490   : > { %p1130_p13 = scmp.lt.u32.totalorder %s1128_s2, %s1124_s8  ;;  %p1132_p12 = scmp.lt.u32.totalorder %s1124_s8, %s1464_s30 }
 0x491   : > { %p1126_p11 = pnand %p1125_p8, %p1537_p0 }
 0x492   : > { %p1131_p3 = por %p1130_p13, %p1129_p10 }
 0x493   : > { %p1127_p6 = pneg %p1126_p11 }
 0x494   : > { %p1133_p5 = por %p1132_p12, %p1131_p3 }
 0x496   : > { %p1134_p9 = pnand %p1133_p5, %p1127_p6 }
 0x498   : > { %1137 = shalt.err (!%p1134_p9)
}
 0x499   : > { %937 = dma.vmem_to_hbm [thread:$0]  (%p1537_p0), %s1466_s5, 128, %s1464_s30, %s658_s11  }
 0x49a PF: > { %s684_s22 = sand.u32 1, %s1180_s12   ;;  %p1538_p1 = scmp.ne.s32.totalorder %s1524_s21, 0 }
 0x49b   : > { %p1539_p2 = scmp.ge.s32.totalorder %s1200_s17, 2  ;;  %s685_s9 = scalar_lea.sflag [#allocation8], %s684_s22 }
 0x49d   : > { %p951_p7 = pnand %p1539_p2, %p1538_p1 }
 0x49f   : > { %1175 = dma.done.wait (!%p951_p7), %s685_s9, 128  }
 0x4a0   : > { %1177 = vsyncadd (!%p951_p7), %s685_s9, 4294967168  ;;  %s22_s17 = sadd.s32 1, %s1200_s17   ;;  %s1540_s25 = sld [smem:[#allocation17_spill]] }
 0x4a1   : > { %p19_p4 = scmp.ge.s32.totalorder %s22_s17, 4   ;;  %s1541_s12 = smov %s1184_s13 }
 0x4a2   : > { %s1542_s13 = smov %s1188_s14  ;;  %s1543_s14 = smov %s1336_s29 }
 0x4a3   : > { %s1544_s15 = smov %s1196_s16  ;;  %21 = sbr.rel (!%p19_p4) target bundleno = 10 (0xa), region = 102 }
 0x4a6   : > { %s1545_s16 = smov %s1540_s25 }
 0x4aa   :  { %690 = vsyncpa [#allocation7], 1 }
 0x4ab   :  { %692 = vsyncpa [#allocation7 + $0x1], 1 }
 0x4ac   :  { %693 = vsyncpa [#allocation10], 1 }
 0x4ad   :  { %695 = vsyncpa [#allocation10 + $0x1], 1 }
 0x4ae   :  { %696 = vsyncpa [#allocation8], 1 }
 0x4af   :  { %698 = vsyncpa [#allocation8 + $0x1], 1 }

</bundles_post_ra>
